<compile_context>
chip_gen: v7x
topology: tpu7x:2x2x1
jax: 0.10.0
libtpu: 0.0.40
codegen_flags: <defaults>
</compile_context>

<pallas_src>
import functools

import numpy as np

import jax
import jax.numpy as jnp
from jax import lax
from jax.experimental import pallas as pl
from jax.experimental.pallas import tpu as pltpu


def _convblock_kernel(x_ref, w_ref, mask_ref, gamma_ref, beta_ref,      # inputs
                      o_ref,                                            # output
                      conv_ref, patch_ref, sum_ref, sq_ref,             # scratch
                      scale_ref, shift_ref,
                      *, N, H, W, K, eps, relu):
    p = pl.program_id(0)          # 0: conv + stats, 1: BN affine + ReLU + store
    n = pl.program_id(1)          # image index
    HW = H * W
    pad = (K - 1) // 2
    Cin = x_ref.shape[1]

    # ---------------- pass 0: conv as a single im2col matmul + batch-stat accumulation --
    @pl.when(p == 0)
    def _conv_pass():
        @pl.when(n == 0)
        def _init_stats():
            sum_ref[...] = jnp.zeros_like(sum_ref)
            sq_ref[...] = jnp.zeros_like(sq_ref)

        x = x_ref[0]                                   # (Cin, H*W) f32, lane dense
        xx = jnp.concatenate([x, x], axis=1)           # wrap-around source for tap shifts

        # im2col: patch row (t*Cin + cin) at column h*W + w holds
        #   x[cin, h + ky - pad, w + kx - pad]   (0 outside the image -> mask row t)
        for ky in range(K):
            for kx in range(K):
                t = ky * K + kx
                s = (ky - pad) * W + (kx - pad)        # flattened source offset
                r = s % HW
                shifted = x if r == 0 else xx[:, r:r + HW]
                patch_ref[pl.ds(t * Cin, Cin), :] = shifted * mask_ref[pl.ds(t, 1), :]

        patches = patch_ref[...].astype(jnp.bfloat16)  # (K*K*Cin, H*W)
        y = jnp.dot(w_ref[...], patches,               # (Cout, H*W), f32 accumulation
                    preferred_element_type=jnp.float32)
        # NOTE: conv bias omitted on purpose — it cancels exactly under training-mode BN.
        conv_ref[n] = y
        sum_ref[...] += jnp.sum(y, axis=1, keepdims=True)
        sq_ref[...] += jnp.sum(y * y, axis=1, keepdims=True)

    # ---------------- pass 1: finalize stats once, fused BN affine + ReLU, single write --
    @pl.when(p == 1)
    def _bn_pass():
        @pl.when(n == 0)
        def _finalize_stats():
            cnt = jnp.float32(N * HW)
            mean = sum_ref[...] / cnt
            var = jnp.maximum(sq_ref[...] / cnt - mean * mean, 0.0)
            scale = gamma_ref[...] * lax.rsqrt(var + eps)
            scale_ref[...] = scale
            shift_ref[...] = beta_ref[...] - mean * scale

        y = conv_ref[n]                                # (Cout, H*W) f32
        out = y * scale_ref[...] + shift_ref[...]
        if relu:
            out = jnp.maximum(out, 0.0)
        o_ref[0] = out


def conv_block(x_nchw, weight, bias, gamma, beta, *, eps=1e-5, relu=True):
    """ConvBlock.forward.  x_nchw: (N, Cin, H, W); weight: (Cout, Cin, K, K)."""
    del bias  # cancels exactly under training-mode BatchNorm
    N, Cin, H, W = x_nchw.shape
    Cout, _, K, _ = weight.shape
    assert K in (1, 3)
    pad = (K - 1) // 2
    HW = H * W
    KKC = K * K * Cin

    # TODO(synk): the fused path keeps the whole-batch conv activation resident in VMEM;
    # for large N*Cout*H*W, tile spatially / spill the intermediate to HBM in bf16 instead.
    assert N * Cout * HW * 4 <= 8 * 1024 * 1024, "activation too large for fused VMEM path"

    # Layout plumbing with no extra HBM passes: NCHW kept, spatial flattened onto lanes;
    # weights reordered to (Cout, ky, kx, cin) and cast to bf16 (tiny).
    x_flat = x_nchw.reshape(N, Cin, HW).astype(jnp.float32)
    w_mat = jnp.transpose(weight, (0, 2, 3, 1)).reshape(Cout, KKC).astype(jnp.bfloat16)
    gamma2 = gamma.reshape(Cout, 1).astype(jnp.float32)
    beta2 = beta.reshape(Cout, 1).astype(jnp.float32)

    # Precomputed 'same'-padding validity masks, one row per tap (small constant input).
    hh = np.arange(H)[:, None]
    ww = np.arange(W)[None, :]
    masks = np.zeros((K * K, HW), np.float32)
    for ky in range(K):
        for kx in range(K):
            dy, dx = ky - pad, kx - pad
            valid = (hh + dy >= 0) & (hh + dy < H) & (ww + dx >= 0) & (ww + dx < W)
            masks[ky * K + kx] = valid.reshape(-1).astype(np.float32)
    masks = jnp.asarray(masks)

    kernel = functools.partial(_convblock_kernel, N=N, H=H, W=W, K=K,
                               eps=float(eps), relu=bool(relu))

    out_flat = pl.pallas_call(
        kernel,
        out_shape=jax.ShapeDtypeStruct((N, Cout, HW), jnp.float32),
        grid_spec=pltpu.PrefetchScalarGridSpec(
            num_scalar_prefetch=0,
            grid=(2, N),                               # (pass, image); both sequential
            in_specs=[
                # x: fetched per image during pass 0 only
                pl.BlockSpec((1, Cin, HW), lambda p, n: ((1 - p) * n, 0, 0)),
                pl.BlockSpec((Cout, KKC), lambda p, n: (0, 0)),
                pl.BlockSpec((K * K, HW), lambda p, n: (0, 0)),
                pl.BlockSpec((Cout, 1), lambda p, n: (0, 0)),
                pl.BlockSpec((Cout, 1), lambda p, n: (0, 0)),
            ],
            # block index is 0 throughout pass 0 and n during pass 1 -> exactly one
            # lane-dense HBM write per image, after the stats are final.
            out_specs=pl.BlockSpec((1, Cout, HW), lambda p, n: (p * n, 0, 0)),
            scratch_shapes=[
                pltpu.VMEM((N, Cout, HW), jnp.float32),   # conv results, whole batch
                pltpu.VMEM((KKC, HW), jnp.float32),       # im2col patches
                pltpu.VMEM((Cout, 1), jnp.float32),       # per-channel sum
                pltpu.VMEM((Cout, 1), jnp.float32),       # per-channel sum of squares
                pltpu.VMEM((Cout, 1), jnp.float32),       # BN scale
                pltpu.VMEM((Cout, 1), jnp.float32),       # BN shift
            ]),
        compiler_params=pltpu.CompilerParams(
            # stats accumulate across images and pass 1 must follow pass 0 -> sequential
            dimension_semantics=("arbitrary", "arbitrary"),
            vmem_limit_bytes=32 * 1024 * 1024),
    )(x_flat, w_mat, masks, gamma2, beta2)

    return out_flat.reshape(N, Cout, H, W)             # free reshape, stays NCHW


if __name__ == "__main__":
    key = jax.random.PRNGKey(0)
    kw, kb, kx = jax.random.split(key, 3)

    N, Cin, H, W = 2, 4, 16, 16
    Cout, K = 8, 3

    # parameter init mirroring nn.Conv2d + kaiming_normal_(fan_out) and nn.BatchNorm2d
    fan_out = Cout * K * K
    weight = jax.random.normal(kw, (Cout, Cin, K, K), jnp.float32) * jnp.sqrt(2.0 / fan_out)
    fan_in = Cin * K * K
    bound = 1.0 / float(np.sqrt(fan_in))
    bias = jax.random.uniform(kb, (Cout,), jnp.float32, -bound, bound)
    gamma = jnp.ones((Cout,), jnp.float32)               # BatchNorm2d default init
    beta = jnp.zeros((Cout,), jnp.float32)

    x = jax.random.normal(kx, (N, Cin, H, W), jnp.float32)

    out = conv_block(x, weight, bias, gamma, beta, relu=True)
    out = jax.block_until_ready(out)

    # Pure-JAX reference: conv(+bias) -> training-mode BN -> ReLU, NCHW.  Inputs rounded
    # to bf16 to mirror the kernel's MXU input precision (both accumulate in f32).
    xr = x.astype(jnp.bfloat16).astype(jnp.float32)
    wr = weight.astype(jnp.bfloat16).astype(jnp.float32)
    y = lax.conv_general_dilated(
        jnp.transpose(xr, (0, 2, 3, 1)), jnp.transpose(wr, (2, 3, 1, 0)),
        window_strides=(1, 1), padding="SAME",
        dimension_numbers=("NHWC", "HWIO", "NHWC")) + bias
    mean = y.mean(axis=(0, 1, 2))
    var = y.var(axis=(0, 1, 2))
    ref = gamma * (y - mean) / jnp.sqrt(var + 1e-5) + beta
    ref = jnp.maximum(ref, 0.0)
    ref = jnp.transpose(ref, (0, 3, 1, 2))

    err = float(jnp.max(jnp.abs(out - ref)))
    assert jnp.allclose(out, ref, atol=2e-3, rtol=2e-3), f"max abs err {err}"
    print("KERNEL_OK")
</pallas_src>

<mosaic_0001>
module attributes {stable_mosaic.version = 11 : i64} {
  func.func @_convblock_kernel(%arg0: i32, %arg1: i32, %arg2: memref<1x4x256xf32, #tpu.memory_space<vmem>>, %arg3: memref<8x36xbf16, #tpu.memory_space<vmem>>, %arg4: memref<9x256xf32, #tpu.memory_space<vmem>>, %arg5: memref<8x1xf32, #tpu.memory_space<vmem>>, %arg6: memref<8x1xf32, #tpu.memory_space<vmem>>, %arg7: memref<1x8x256xf32, #tpu.memory_space<vmem>>, %arg8: memref<2x8x256xf32, #tpu.memory_space<vmem>>, %arg9: memref<36x256xf32, #tpu.memory_space<vmem>>, %arg10: memref<8x1xf32, #tpu.memory_space<vmem>>, %arg11: memref<8x1xf32, #tpu.memory_space<vmem>>, %arg12: memref<8x1xf32, #tpu.memory_space<vmem>>, %arg13: memref<8x1xf32, #tpu.memory_space<vmem>>) attributes {dimension_semantics = [#tpu.dimension_semantics<arbitrary>, #tpu.dimension_semantics<arbitrary>], iteration_bounds = array<i64: 2, 2>, scalar_prefetch = 0 : i64, scratch_operands = 6 : i64, tpu.core_type = #tpu.core_type<tc>, window_params = [{transform_indices = @transform_0, window_bounds = array<i64: 1, 4, 256>}, {pipeline_mode = #tpu.pipeline_mode<synchronous>, transform_indices = @transform_1, window_bounds = array<i64: 8, 36>}, {pipeline_mode = #tpu.pipeline_mode<synchronous>, transform_indices = @transform_2, window_bounds = array<i64: 9, 256>}, {pipeline_mode = #tpu.pipeline_mode<synchronous>, transform_indices = @transform_3, window_bounds = array<i64: 8, 1>}, {pipeline_mode = #tpu.pipeline_mode<synchronous>, transform_indices = @transform_4, window_bounds = array<i64: 8, 1>}, {transform_indices = @transform_5, window_bounds = array<i64: 1, 8, 256>}]} {
    %c0_i32 = arith.constant 0 : i32
    %0 = arith.cmpi eq, %arg0, %c0_i32 : i32
    %1 = arith.extui %0 : i1 to i32
    %c0_i32_0 = arith.constant 0 : i32
    %2 = arith.cmpi ne, %1, %c0_i32_0 : i32
    scf.if %2 {
      %c0_i32_2 = arith.constant 0 : i32
      %6 = arith.cmpi eq, %arg1, %c0_i32_2 : i32
      %7 = arith.extui %6 : i1 to i32
      %c0_i32_3 = arith.constant 0 : i32
      %8 = arith.cmpi ne, %7, %c0_i32_3 : i32
      scf.if %8 {
        %cst_44 = arith.constant 0.000000e+00 : f32
        %75 = vector.broadcast %cst_44 : f32 to vector<8x1xf32>
        %c0_45 = arith.constant 0 : index
        %c0_46 = arith.constant 0 : index
        %76 = vector.load %arg10[%c0_45, %c0_46] : memref<8x1xf32, #tpu.memory_space<vmem>>, vector<8x1xf32>
        tpu.vector_store %arg10[%c0_45, %c0_46], %75 {strides = array<i32>} : memref<8x1xf32, #tpu.memory_space<vmem>>, vector<8x1xf32>,
        %cst_47 = arith.constant 0.000000e+00 : f32
        %77 = vector.broadcast %cst_47 : f32 to vector<8x1xf32>
        %c0_48 = arith.constant 0 : index
        %c0_49 = arith.constant 0 : index
        %78 = vector.load %arg11[%c0_48, %c0_49] : memref<8x1xf32, #tpu.memory_space<vmem>>, vector<8x1xf32>
        tpu.vector_store %arg11[%c0_48, %c0_49], %77 {strides = array<i32>} : memref<8x1xf32, #tpu.memory_space<vmem>>, vector<8x1xf32>,
      } else {
      }
      %c0 = arith.constant 0 : index
      %c0_4 = arith.constant 0 : index
      %c0_5 = arith.constant 0 : index
      %9 = vector.load %arg2[%c0, %c0_4, %c0_5] : memref<1x4x256xf32, #tpu.memory_space<vmem>>, vector<1x4x256xf32>
      %10 = vector.shape_cast %9 : vector<1x4x256xf32> to vector<4x256xf32>
      %11 = tpu.concatenate %10, %10 in 1 : vector<4x256xf32>, vector<4x256xf32> -> vector<4x512xf32>
      %12 = vector.extract_strided_slice %11 {offsets = [0, 239], sizes = [4, 256], strides = [1, 1]} : vector<4x512xf32> to vector<4x256xf32>
      %c0_6 = arith.constant 0 : index
      %c0_7 = arith.constant 0 : index
      %13 = vector.load %arg4[%c0_6, %c0_7] : memref<9x256xf32, #tpu.memory_space<vmem>>, vector<1x256xf32>
      %14 = vector.broadcast %13 : vector<1x256xf32> to vector<4x256xf32>
      %15 = arith.mulf %12, %14 : vector<4x256xf32>
      %c0_8 = arith.constant 0 : index
      %c0_9 = arith.constant 0 : index
      %16 = vector.load %arg9[%c0_8, %c0_9] : memref<36x256xf32, #tpu.memory_space<vmem>>, vector<4x256xf32>
      tpu.vector_store %arg9[%c0_8, %c0_9], %15 {strides = array<i32>} : memref<36x256xf32, #tpu.memory_space<vmem>>, vector<4x256xf32>,
      %17 = vector.extract_strided_slice %11 {offsets = [0, 240], sizes = [4, 256], strides = [1, 1]} : vector<4x512xf32> to vector<4x256xf32>
      %c1 = arith.constant 1 : index
      %c0_10 = arith.constant 0 : index
      %18 = vector.load %arg4[%c1, %c0_10] : memref<9x256xf32, #tpu.memory_space<vmem>>, vector<1x256xf32>
      %19 = vector.broadcast %18 : vector<1x256xf32> to vector<4x256xf32>
      %20 = arith.mulf %17, %19 : vector<4x256xf32>
      %c4 = arith.constant 4 : index
      %c0_11 = arith.constant 0 : index
      %21 = vector.load %arg9[%c4, %c0_11] : memref<36x256xf32, #tpu.memory_space<vmem>>, vector<4x256xf32>
      tpu.vector_store %arg9[%c4, %c0_11], %20 {strides = array<i32>} : memref<36x256xf32, #tpu.memory_space<vmem>>, vector<4x256xf32>,
      %22 = vector.extract_strided_slice %11 {offsets = [0, 241], sizes = [4, 256], strides = [1, 1]} : vector<4x512xf32> to vector<4x256xf32>
      %c2 = arith.constant 2 : index
      %c0_12 = arith.constant 0 : index
      %23 = vector.load %arg4[%c2, %c0_12] : memref<9x256xf32, #tpu.memory_space<vmem>>, vector<1x256xf32>
      %24 = vector.broadcast %23 : vector<1x256xf32> to vector<4x256xf32>
      %25 = arith.mulf %22, %24 : vector<4x256xf32>
      %c8 = arith.constant 8 : index
      %c0_13 = arith.constant 0 : index
      %26 = vector.load %arg9[%c8, %c0_13] : memref<36x256xf32, #tpu.memory_space<vmem>>, vector<4x256xf32>
      tpu.vector_store %arg9[%c8, %c0_13], %25 {strides = array<i32>} : memref<36x256xf32, #tpu.memory_space<vmem>>, vector<4x256xf32>,
      %27 = vector.extract_strided_slice %11 {offsets = [0, 255], sizes = [4, 256], strides = [1, 1]} : vector<4x512xf32> to vector<4x256xf32>
      %c3 = arith.constant 3 : index
      %c0_14 = arith.constant 0 : index
      %28 = vector.load %arg4[%c3, %c0_14] : memref<9x256xf32, #tpu.memory_space<vmem>>, vector<1x256xf32>
      %29 = vector.broadcast %28 : vector<1x256xf32> to vector<4x256xf32>
      %30 = arith.mulf %27, %29 : vector<4x256xf32>
      %c12 = arith.constant 12 : index
      %c0_15 = arith.constant 0 : index
      %31 = vector.load %arg9[%c12, %c0_15] : memref<36x256xf32, #tpu.memory_space<vmem>>, vector<4x256xf32>
      tpu.vector_store %arg9[%c12, %c0_15], %30 {strides = array<i32>} : memref<36x256xf32, #tpu.memory_space<vmem>>, vector<4x256xf32>,
      %c4_16 = arith.constant 4 : index
      %c0_17 = arith.constant 0 : index
      %32 = vector.load %arg4[%c4_16, %c0_17] : memref<9x256xf32, #tpu.memory_space<vmem>>, vector<1x256xf32>
      %33 = vector.broadcast %32 : vector<1x256xf32> to vector<4x256xf32>
      %34 = arith.mulf %10, %33 : vector<4x256xf32>
      %c16 = arith.constant 16 : index
      %c0_18 = arith.constant 0 : index
      %35 = vector.load %arg9[%c16, %c0_18] : memref<36x256xf32, #tpu.memory_space<vmem>>, vector<4x256xf32>
      tpu.vector_store %arg9[%c16, %c0_18], %34 {strides = array<i32>} : memref<36x256xf32, #tpu.memory_space<vmem>>, vector<4x256xf32>,
      %36 = vector.extract_strided_slice %11 {offsets = [0, 1], sizes = [4, 256], strides = [1, 1]} : vector<4x512xf32> to vector<4x256xf32>
      %c5 = arith.constant 5 : index
      %c0_19 = arith.constant 0 : index
      %37 = vector.load %arg4[%c5, %c0_19] : memref<9x256xf32, #tpu.memory_space<vmem>>, vector<1x256xf32>
      %38 = vector.broadcast %37 : vector<1x256xf32> to vector<4x256xf32>
      %39 = arith.mulf %36, %38 : vector<4x256xf32>
      %c20 = arith.constant 20 : index
      %c0_20 = arith.constant 0 : index
      %40 = vector.load %arg9[%c20, %c0_20] : memref<36x256xf32, #tpu.memory_space<vmem>>, vector<4x256xf32>
      tpu.vector_store %arg9[%c20, %c0_20], %39 {strides = array<i32>} : memref<36x256xf32, #tpu.memory_space<vmem>>, vector<4x256xf32>,
      %41 = vector.extract_strided_slice %11 {offsets = [0, 15], sizes = [4, 256], strides = [1, 1]} : vector<4x512xf32> to vector<4x256xf32>
      %c6 = arith.constant 6 : index
      %c0_21 = arith.constant 0 : index
      %42 = vector.load %arg4[%c6, %c0_21] : memref<9x256xf32, #tpu.memory_space<vmem>>, vector<1x256xf32>
      %43 = vector.broadcast %42 : vector<1x256xf32> to vector<4x256xf32>
      %44 = arith.mulf %41, %43 : vector<4x256xf32>
      %c24 = arith.constant 24 : index
      %c0_22 = arith.constant 0 : index
      %45 = vector.load %arg9[%c24, %c0_22] : memref<36x256xf32, #tpu.memory_space<vmem>>, vector<4x256xf32>
      tpu.vector_store %arg9[%c24, %c0_22], %44 {strides = array<i32>} : memref<36x256xf32, #tpu.memory_space<vmem>>, vector<4x256xf32>,
      %46 = vector.extract_strided_slice %11 {offsets = [0, 16], sizes = [4, 256], strides = [1, 1]} : vector<4x512xf32> to vector<4x256xf32>
      %c7 = arith.constant 7 : index
      %c0_23 = arith.constant 0 : index
      %47 = vector.load %arg4[%c7, %c0_23] : memref<9x256xf32, #tpu.memory_space<vmem>>, vector<1x256xf32>
      %48 = vector.broadcast %47 : vector<1x256xf32> to vector<4x256xf32>
      %49 = arith.mulf %46, %48 : vector<4x256xf32>
      %c28 = arith.constant 28 : index
      %c0_24 = arith.constant 0 : index
      %50 = vector.load %arg9[%c28, %c0_24] : memref<36x256xf32, #tpu.memory_space<vmem>>, vector<4x256xf32>
      tpu.vector_store %arg9[%c28, %c0_24], %49 {strides = array<i32>} : memref<36x256xf32, #tpu.memory_space<vmem>>, vector<4x256xf32>,
      %51 = vector.extract_strided_slice %11 {offsets = [0, 17], sizes = [4, 256], strides = [1, 1]} : vector<4x512xf32> to vector<4x256xf32>
      %c8_25 = arith.constant 8 : index
      %c0_26 = arith.constant 0 : index
      %52 = vector.load %arg4[%c8_25, %c0_26] : memref<9x256xf32, #tpu.memory_space<vmem>>, vector<1x256xf32>
      %53 = vector.broadcast %52 : vector<1x256xf32> to vector<4x256xf32>
      %54 = arith.mulf %51, %53 : vector<4x256xf32>
      %c32 = arith.constant 32 : index
      %c0_27 = arith.constant 0 : index
      %55 = vector.load %arg9[%c32, %c0_27] : memref<36x256xf32, #tpu.memory_space<vmem>>, vector<4x256xf32>
      tpu.vector_store %arg9[%c32, %c0_27], %54 {strides = array<i32>} : memref<36x256xf32, #tpu.memory_space<vmem>>, vector<4x256xf32>,
      %c0_28 = arith.constant 0 : index
      %c0_29 = arith.constant 0 : index
      %56 = vector.load %arg9[%c0_28, %c0_29] : memref<36x256xf32, #tpu.memory_space<vmem>>, vector<36x256xf32>
      %57 = arith.truncf %56 : vector<36x256xf32> to vector<36x256xbf16>
      %c0_30 = arith.constant 0 : index
      %c0_31 = arith.constant 0 : index
      %58 = vector.load %arg3[%c0_30, %c0_31] : memref<8x36xbf16, #tpu.memory_space<vmem>>, vector<8x36xbf16>
      %cst = arith.constant dense<0.000000e+00> : vector<8x256xf32>
      %59 = tpu.matmul %58, %57, %cst {dimension_numbers = #tpu.dot_dimension_numbers<[1], [0], [0], [1], [0, 0, 1, 1], [], []>} : vector<8x36xbf16>, vector<36x256xbf16>, vector<8x256xf32> -> vector<8x256xf32>
      %60 = arith.index_cast %arg1 : i32 to index
      %c0_32 = arith.constant 0 : index
      %c0_33 = arith.constant 0 : index
      %61 = vector.load %arg8[%60, %c0_32, %c0_33] : memref<2x8x256xf32, #tpu.memory_space<vmem>>, vector<1x8x256xf32>
      %62 = vector.shape_cast %61 : vector<1x8x256xf32> to vector<8x256xf32>
      %63 = vector.shape_cast %59 : vector<8x256xf32> to vector<1x8x256xf32>
      tpu.vector_store %arg8[%60, %c0_32, %c0_33], %63 {strides = array<i32>} : memref<2x8x256xf32, #tpu.memory_space<vmem>>, vector<1x8x256xf32>,
      %c0_34 = arith.constant 0 : index
      %c0_35 = arith.constant 0 : index
      %64 = vector.load %arg10[%c0_34, %c0_35] : memref<8x1xf32, #tpu.memory_space<vmem>>, vector<8x1xf32>
      %cst_36 = arith.constant dense<0.000000e+00> : vector<8xf32>
      %65 = vector.multi_reduction <add>, %59, %cst_36 [1] : vector<8x256xf32> to vector<8xf32>
      %66 = vector.shape_cast %65 : vector<8xf32> to vector<8x1xf32>
      %67 = arith.addf %64, %66 : vector<8x1xf32>
      %c0_37 = arith.constant 0 : index
      %c0_38 = arith.constant 0 : index
      %68 = vector.load %arg10[%c0_37, %c0_38] : memref<8x1xf32, #tpu.memory_space<vmem>>, vector<8x1xf32>
      tpu.vector_store %arg10[%c0_37, %c0_38], %67 {strides = array<i32>} : memref<8x1xf32, #tpu.memory_space<vmem>>, vector<8x1xf32>,
      %c0_39 = arith.constant 0 : index
      %c0_40 = arith.constant 0 : index
      %69 = vector.load %arg11[%c0_39, %c0_40] : memref<8x1xf32, #tpu.memory_space<vmem>>, vector<8x1xf32>
      %70 = arith.mulf %59, %59 : vector<8x256xf32>
      %cst_41 = arith.constant dense<0.000000e+00> : vector<8xf32>
      %71 = vector.multi_reduction <add>, %70, %cst_41 [1] : vector<8x256xf32> to vector<8xf32>
      %72 = vector.shape_cast %71 : vector<8xf32> to vector<8x1xf32>
      %73 = arith.addf %69, %72 : vector<8x1xf32>
      %c0_42 = arith.constant 0 : index
      %c0_43 = arith.constant 0 : index
      %74 = vector.load %arg11[%c0_42, %c0_43] : memref<8x1xf32, #tpu.memory_space<vmem>>, vector<8x1xf32>
      tpu.vector_store %arg11[%c0_42, %c0_43], %73 {strides = array<i32>} : memref<8x1xf32, #tpu.memory_space<vmem>>, vector<8x1xf32>,
    } else {
    }
    %c1_i32 = arith.constant 1 : i32
    %3 = arith.cmpi eq, %arg0, %c1_i32 : i32
    %4 = arith.extui %3 : i1 to i32
    %c0_i32_1 = arith.constant 0 : i32
    %5 = arith.cmpi ne, %4, %c0_i32_1 : i32
    scf.if %5 {
      %c0_i32_2 = arith.constant 0 : i32
      %6 = arith.cmpi eq, %arg1, %c0_i32_2 : i32
      %7 = arith.extui %6 : i1 to i32
      %c0_i32_3 = arith.constant 0 : i32
      %8 = arith.cmpi ne, %7, %c0_i32_3 : i32
      scf.if %8 {
        %c0_12 = arith.constant 0 : index
        %c0_13 = arith.constant 0 : index
        %23 = vector.load %arg10[%c0_12, %c0_13] : memref<8x1xf32, #tpu.memory_space<vmem>>, vector<8x1xf32>
        %cst_14 = arith.constant 5.120000e+02 : f32
        %24 = vector.broadcast %cst_14 : f32 to vector<8x1xf32>
        %25 = arith.divf %23, %24 : vector<8x1xf32>
        %c0_15 = arith.constant 0 : index
        %c0_16 = arith.constant 0 : index
        %26 = vector.load %arg11[%c0_15, %c0_16] : memref<8x1xf32, #tpu.memory_space<vmem>>, vector<8x1xf32>
        %cst_17 = arith.constant 5.120000e+02 : f32
        %27 = vector.broadcast %cst_17 : f32 to vector<8x1xf32>
        %28 = arith.divf %26, %27 : vector<8x1xf32>
        %29 = arith.mulf %25, %25 : vector<8x1xf32>
        %30 = arith.subf %28, %29 : vector<8x1xf32>
        %cst_18 = arith.constant 0.000000e+00 : f32
        %31 = vector.broadcast %cst_18 : f32 to vector<8x1xf32>
        %32 = arith.maximumf %30, %31 : vector<8x1xf32>
        %c0_19 = arith.constant 0 : index
        %c0_20 = arith.constant 0 : index
        %33 = vector.load %arg5[%c0_19, %c0_20] : memref<8x1xf32, #tpu.memory_space<vmem>>, vector<8x1xf32>
        %cst_21 = arith.constant 9.99999974E-6 : f32
        %34 = vector.broadcast %cst_21 : f32 to vector<8x1xf32>
        %35 = arith.addf %32, %34 : vector<8x1xf32>
        %36 = math.rsqrt %35 : vector<8x1xf32>
        %37 = arith.mulf %33, %36 : vector<8x1xf32>
        %c0_22 = arith.constant 0 : index
        %c0_23 = arith.constant 0 : index
        %38 = vector.load %arg12[%c0_22, %c0_23] : memref<8x1xf32, #tpu.memory_space<vmem>>, vector<8x1xf32>
        tpu.vector_store %arg12[%c0_22, %c0_23], %37 {strides = array<i32>} : memref<8x1xf32, #tpu.memory_space<vmem>>, vector<8x1xf32>,
        %c0_24 = arith.constant 0 : index
        %c0_25 = arith.constant 0 : index
        %39 = vector.load %arg6[%c0_24, %c0_25] : memref<8x1xf32, #tpu.memory_space<vmem>>, vector<8x1xf32>
        %40 = arith.mulf %25, %37 : vector<8x1xf32>
        %41 = arith.subf %39, %40 : vector<8x1xf32>
        %c0_26 = arith.constant 0 : index
        %c0_27 = arith.constant 0 : index
        %42 = vector.load %arg13[%c0_26, %c0_27] : memref<8x1xf32, #tpu.memory_space<vmem>>, vector<8x1xf32>
        tpu.vector_store %arg13[%c0_26, %c0_27], %41 {strides = array<i32>} : memref<8x1xf32, #tpu.memory_space<vmem>>, vector<8x1xf32>,
      } else {
      }
      %9 = arith.index_cast %arg1 : i32 to index
      %c0 = arith.constant 0 : index
      %c0_4 = arith.constant 0 : index
      %10 = vector.load %arg8[%9, %c0, %c0_4] : memref<2x8x256xf32, #tpu.memory_space<vmem>>, vector<1x8x256xf32>
      %11 = vector.shape_cast %10 : vector<1x8x256xf32> to vector<8x256xf32>
      %c0_5 = arith.constant 0 : index
      %c0_6 = arith.constant 0 : index
      %12 = vector.load %arg12[%c0_5, %c0_6] : memref<8x1xf32, #tpu.memory_space<vmem>>, vector<8x1xf32>
      %13 = vector.broadcast %12 : vector<8x1xf32> to vector<8x256xf32>
      %14 = arith.mulf %11, %13 : vector<8x256xf32>
      %c0_7 = arith.constant 0 : index
      %c0_8 = arith.constant 0 : index
      %15 = vector.load %arg13[%c0_7, %c0_8] : memref<8x1xf32, #tpu.memory_space<vmem>>, vector<8x1xf32>
      %16 = vector.broadcast %15 : vector<8x1xf32> to vector<8x256xf32>
      %17 = arith.addf %14, %16 : vector<8x256xf32>
      %cst = arith.constant 0.000000e+00 : f32
      %18 = vector.broadcast %cst : f32 to vector<8x256xf32>
      %19 = arith.maximumf %17, %18 : vector<8x256xf32>
      %c0_9 = arith.constant 0 : index
      %c0_10 = arith.constant 0 : index
      %c0_11 = arith.constant 0 : index
      %20 = vector.load %arg7[%c0_9, %c0_10, %c0_11] : memref<1x8x256xf32, #tpu.memory_space<vmem>>, vector<1x8x256xf32>
      %21 = vector.shape_cast %20 : vector<1x8x256xf32> to vector<8x256xf32>
      %22 = vector.shape_cast %19 : vector<8x256xf32> to vector<1x8x256xf32>
      tpu.vector_store %arg7[%c0_9, %c0_10, %c0_11], %22 {strides = array<i32>} : memref<1x8x256xf32, #tpu.memory_space<vmem>>, vector<1x8x256xf32>,
    } else {
    }
    return
  }
  func.func @transform_0(%arg0: i32, %arg1: i32) -> (i32, i32, i32) {
    %c1_i32 = arith.constant 1 : i32
    %0 = arith.subi %c1_i32, %arg0 : i32
    %1 = arith.muli %0, %arg1 : i32
    %c0_i32 = arith.constant 0 : i32
    %c0_i32_0 = arith.constant 0 : i32
    %c0_i32_1 = arith.constant 0 : i32
    return %1, %c0_i32, %c0_i32_0 : i32, i32, i32
  }
  func.func @transform_1(%arg0: i32, %arg1: i32) -> (i32, i32) {
    %c0_i32 = arith.constant 0 : i32
    %c0_i32_0 = arith.constant 0 : i32
    %c0_i32_1 = arith.constant 0 : i32
    return %c0_i32, %c0_i32_0 : i32, i32
  }
  func.func @transform_2(%arg0: i32, %arg1: i32) -> (i32, i32) {
    %c0_i32 = arith.constant 0 : i32
    %c0_i32_0 = arith.constant 0 : i32
    %c0_i32_1 = arith.constant 0 : i32
    return %c0_i32, %c0_i32_0 : i32, i32
  }
  func.func @transform_3(%arg0: i32, %arg1: i32) -> (i32, i32) {
    %c0_i32 = arith.constant 0 : i32
    %c0_i32_0 = arith.constant 0 : i32
    %c0_i32_1 = arith.constant 0 : i32
    return %c0_i32, %c0_i32_0 : i32, i32
  }
  func.func @transform_4(%arg0: i32, %arg1: i32) -> (i32, i32) {
    %c0_i32 = arith.constant 0 : i32
    %c0_i32_0 = arith.constant 0 : i32
    %c0_i32_1 = arith.constant 0 : i32
    return %c0_i32, %c0_i32_0 : i32, i32
  }
  func.func @transform_5(%arg0: i32, %arg1: i32) -> (i32, i32, i32) {
    %0 = arith.muli %arg0, %arg1 : i32
    %c0_i32 = arith.constant 0 : i32
    %c0_i32_0 = arith.constant 0 : i32
    %c0_i32_1 = arith.constant 0 : i32
    return %0, %c0_i32, %c0_i32_0 : i32, i32, i32
  }
}

</mosaic_0001>

<bundles_post_ra>
// kernel: tpu_custom_call.1
= control target key start
LH: loop header
LB: loop body
LE: loop exit
PB: predicated region body
PF: predicated region fallthrough
CT: control target
= control target key end

     0   :  { %10 = vsyncpa [#allocation9], 0  ;;  %s1482_s0 = inlined_call_operand.vmem [shape: f32[2,4,256], index: 0, kind: input, shape index: {}]   ;;  %s1483_s1 = inlined_call_operand.vmem [shape: bf16[8,36], index: 1, kind: input, shape index: {}]   ;;  %s1484_s2 = inlined_call_operand.hbm [shape: f32[9,256], index: 2, kind: input, shape index: {}]   ;;  %s1485_s3 = inlined_call_operand.vmem [shape: f32[8,1], index: 3, kind: input, shape index: {}]   ;;  %s1486_s4 = inlined_call_operand.vmem [shape: f32[8,1], index: 4, kind: input, shape index: {}]   ;;  %s1487_s5 = inlined_call_operand.hbm [shape: f32[2,8,256], index: 5, kind: output, shape index: {}]  }
   0x1   :  { %11 = vsyncpa [#allocation10], 0 }
   0x2   :  { %13 = vsyncpa [#allocation10 + $0x1], 0  ;;  %s1159_s18 = smov 0   ;;  %s1161_s19 = smov 0  }
   0x3   :  { %s1163_s20 = smov 0   ;;  %s1165_s21 = smov 0  }
   0x4   :  { %s1167_s22 = smov 0   ;;  %s1169_s23 = smov 0  }
   0x5   :  { %s1171_s24 = smov 0   ;;  %s1173_s25 = smov 0  }
   0x6 LB: > { %s858_s26 = sadd.s32 4294967295, %s1112_s25   ;;  %s859_s27 = sadd.s32 4294967294, %s1112_s25   ;;  %s1112_s25 = sphi %s1173_s25, %s19_s25   ;;  %s1108_s24 = sphi %s1171_s24, %s1510_s24   ;;  %s1104_s23 = sphi %s1169_s23, %s1509_s23   ;;  %s1100_s22 = sphi %s1167_s22, %s1508_s22   ;;  %s1096_s21 = sphi %s1165_s21, %s1507_s21   ;;  %s1092_s20 = sphi %s1163_s20, %s1506_s20   ;;  %s1088_s19 = sphi %s1161_s19, %s1505_s19   ;;  %s1084_s18 = sphi %s1159_s18, %s1504_s18  }
   0x7   : > { %s28_s28 = sadd.s32 1, %s1104_s23  ;;  %s31_s29 = sadd.s32 1, %s1108_s24 }
   0x8   : > { %p29_p0 = scmp.ge.s32.totalorder %s28_s28, 2  ;;  %s149_s30 = smul.u32 %s1104_s23, %s1108_s24 }
   0x9   : > { %s154_s6 = sadd.s32 1, %s1092_s20  ;;  %p164_p1 = scmp.ne.s32.totalorder %s1092_s20, %s1088_s19 }
   0xa   : > { %s1512_s28 = smov (%p29_p0, %s28_s28), 0  ;;  %s1514_s29 = smov (!%p29_p0, %s31_s29), %s1108_s24 }
   0xb   : > { %p165_p2 = scmp.eq.s32.totalorder %s858_s26, 3  ;;  %p170_p3 = scmp.ne.s32.totalorder %s1088_s19, %s1084_s18 }
   0xc   : > { %p33_p4 = scmp.ge.s32.totalorder %s1514_s29, 2  ;;  %p171_p5 = scmp.eq.s32.totalorder %s859_s27, 3 }
   0xd   : > { %p1213_p6 = por %p165_p2, %p164_p1  ;;  %p860_p7 = scmp.ge.s32.totalorder %s1112_s25, 1 }
   0xe   : > { %s1516_s29 = smov (%p33_p4, %s1514_s29), 0  ;;  %p1220_p8 = por %p171_p5, %p170_p3 }
   0xf   : > { %s1493_s7 = scalar_select %p1213_p6, 1, 0 }
  0x10   : > { %1494 = sst [smem:[#allocation14_spill]] %s1516_s29  ;;  %p178_p9 = scmp.lt.s32.totalorder %s1112_s25, 5 }
  0x11   : > { %s1495_s8 = scalar_select %p1220_p8, 1, 0 }
  0x12   : > { %s150_s9 = smul.u32 %s1516_s29, %s1512_s28  ;;  %p1227_p10 = pnand %p860_p7, %p178_p9 }
  0x13   : > { %p1231_p11 = scmp.eq.s32.totalorder %s858_s26, 0  ;;  %s1114_s13 = smov [#allocation8]  }
  0x14   : > { %s1496_s10 = scalar_select %p1227_p10, 1, 0 }
  0x15   : > { %s1497_s11 = scalar_select %p1231_p11, 1, 0 }
  0x16   : > { %s151_s12 = ssub.s32 %s149_s30, %s150_s9  ;;  %p893_p13 = pneg %p1227_p10 }
  0x17   : > { %p152_p12 = scmp.eq.s32.totalorder %s151_s12, 0  ;;  %s193_s14 = sshll.u32 %s1114_s13, 4  ;;  %s194_s14 = int_to_ptr.vmem [resolvable:$true] %s193_s14 }
  0x18   : > { %p1242_p0 = pnand %p1231_p11, %p893_p13  ;;  %s986_s27 = scalar_lea.hbm %s1484_s2, 512 }
  0x19   : > { %s1238_s15 = scalar_select %p152_p12, %s1092_s20, %s154_s6  }
  0x1a   : > { %p987_p1 = scmp.ne.s32.totalorder %s1484_s2, %s986_s27  ;;  %p988_p2 = pneg %p1242_p0 }
  0x1b   : > { %p993_p5 = scmp.lt.u32.totalorder %s986_s27, %s1484_s2 }
  0x1c   : > { %p989_p3 = pnand %p988_p2, %p987_p1 }
  0x1e   : > { %p990_p4 = pneg %p989_p3 }
  0x20   : > { %p995_p7 = pnand %p993_p5, %p990_p4 }
  0x22   : > { %998 = shalt.err (!%p995_p7)
}
  0x23   : > { %s999_s12 = scalar_lea.vmem %s194_s14, 512  ;;  %p1007_p8 = scmp.lt.s32.totalorder %s194_s14, %s194_s14 }
  0x24   : > { %p1000_p9 = scmp.ne.s32.totalorder %s194_s14, %s999_s12  ;;  %p1008_p6 = scmp.lt.s32.totalorder %s999_s12, %s999_s12 }
  0x26   : > { %p1002_p12 = pnand %p1000_p9, %p988_p2  ;;  %p1009_p11 = por %p1008_p6, %p1007_p8 }
  0x28   : > { %p1003_p13 = pneg %p1002_p12 }
  0x2a   : > { %p1010_p10 = pnand %p1009_p11, %p1003_p13 }
  0x2c   : > { %1013 = shalt.err (!%p1010_p10)
}
  0x2d   : > { %s1115_s29 = smov 256   ;;  %s1116_s13 = smov 16  }
  0x2e   : > { %896 = dma.hbm_to_vmem [thread:$0]  (!%p1242_p0), %s1484_s2, 512, %s194_s14, [#allocation9], %s1115_s29, %s1115_s29, %s1116_s13  }
  0x2f   : > { %p1499_p1 = scmp.ne.s32.totalorder %s1496_s10, 0 }
  0x30   : > { %p1500_p3 = scmp.ne.s32.totalorder (!%p1499_p1), %s1497_s11, 0 }
  0x31   : > { %227 = sbr.rel (%p1499_p1) target bundleno = 956 (0x3bc), region = 40 }
  0x38   : > { %1075 = dma.done.wait (%p1500_p3), [#allocation9], 512  }
  0x39   : > { %1077 = vsyncadd (%p1500_p3), [#allocation9], 4294966784  ;;  %s254_s27 = sand.u32 1, %s1088_s19   ;;  %s257_s30 = ssub.s32 1, %s1100_s22 }
  0x3a   : > { %s865_s16 = sshll.u32 %s254_s27, 4  ;;  %s258_s6 = smul.u32 %s1096_s21, %s257_s30 }
  0x3b   : > { %s1278_s29 = scalar_lea.vmem [#allocation11], %s865_s16  ;;  %p868_p8 = scmp.ne.s32.totalorder %s1100_s22, 0 }
  0x3c   : > { %p259_p6 = scmp.lt.s32.totalorder %s258_s6, 1  ;;  %p869_p10 = scmp.ne.s32.totalorder (!%p868_p8), %s1096_s21, 0 }
  0x3d   : > { %271 = sbr.rel (%p868_p8) target bundleno = 752 (0x2f0), region = 48 }
  0x3e   : > { %s1518_s6 = smov (!%p259_p6, %s258_s6), 1 }
  0x3f   : > { %s883_s14 = sshll.u32 %s1518_s6, 3 }
  0x40   : > { %s1276_s12 = scalar_lea.vmem %s1482_s0, %s883_s14 }
  0x44   : > { %275 = sbr.rel (%p869_p10) target bundleno = 75 (0x4b), region = 52  ;;  %vm276_vm0 = vcmask (!%p869_p10), 7168   ;;  %v1117_v0 = vmov (!%p869_p10), 0.0  }
  0x45   : > { %277 = vst.msk [vmem:[#allocation4] sm:$0xff] (!%p869_p10), %vm276_vm0, %v1117_v0  ;;  %278 = vst.msk [vmem:[#allocation5] sm:$0xff] (!%p869_p10), %vm276_vm0, %v1117_v0 }
  0x4b PF: > { %v285_v1 = vlaneseq  ;;  %v403_v3 = vld [vmem:[#allocation8 + $0x3] ss:$8 sm:$0x3]  ;;  %v322_v4 = vld [vmem:[#allocation8 + $0x1] ss:$8 sm:$0x3] }
  0x4c   : > { %s1118_s11 = smov 127   ;;  %s1119_s13 = smov 112   ;;  %v283_v11 = vld [vmem:[#allocation8] ss:$8 sm:$0x3]  ;;  %v1321_v31 = vld [vmem:[%s1276_s12] sm:$0xff] }
  0x4d   : > { %v286_v2 = vshrl.u32 %v285_v1, 7  ;;  %v364_v14 = vld [vmem:[#allocation8 + $0x2] ss:$8 sm:$0x3]  ;;  %s1120_s17 = smov 111   ;;  %s1121_s26 = smov 113   ;;  %v1325_v34 = vcombine.high %v1321_v31, %v1321_v31 }
  0x4e   : > { %v464_v17 = vld [vmem:[#allocation8 + $0x5] ss:$8 sm:$0x3]  ;;  %v541_v20 = vld [vmem:[#allocation8 + $0x7] ss:$8 sm:$0x3] }
  0x4f   : > { %v1282_v5 = vsub.s32 0, %v286_v2  ;;  %v1284_v6 = vsub.s32 1, %v286_v2  ;;  %s1122_s30 = smov 1   ;;  %v504_v23 = vld [vmem:[#allocation8 + $0x6] ss:$8 sm:$0x3] }
  0x50   : > { %s1123_s16 = smov 16   ;;  %v581_v26 = vld [vmem:[#allocation8 + $0x10] ss:$8 sm:$0x3]  ;;  %s1124_s6 = smov 15   ;;  %vm297_vm1 = vcmask 908288  }
  0x51   : > { %v408_v7 = vrot.slane %v403_v3, %v1282_v5  ;;  %v327_v8 = vrot.slane %v322_v4, %v1282_v5  ;;  %v412_v9 = vrot.slane %v403_v3, %v1284_v6  ;;  %v331_v10 = vrot.slane %v322_v4, %v1284_v6  ;;  %s1125_s14 = smov 17   ;;  %v445_v59 = vld [vmem:[#allocation8 + $0x4] ss:$8 sm:$0x3]  ;;  %s884_s12 = sshll.u32 %s1096_s21, 4 }
  0x52   : > { %v292_v12 = vrot.slane %v283_v11, %v1284_v6  ;;  %v288_v13 = vrot.slane %v283_v11, %v1282_v5  ;;  %v373_v15 = vrot.slane %v364_v14, %v1284_v6  ;;  %v369_v16 = vrot.slane %v364_v14, %v1282_v5 }
  0x53   : > { %413 = vrot.lane.b32.xlu1 %v408_v7, %s1118_s11  ;;  %332 = vrot.lane.b32.xlu0 %v327_v8, %s1119_s13  ;;  %v473_v18 = vrot.slane %v464_v17, %v1284_v6  ;;  %v469_v19 = vrot.slane %v464_v17, %v1282_v5  ;;  %v550_v21 = vrot.slane %v541_v20, %v1284_v6  ;;  %vm378_vm2 = vcmask 924672  }
  0x54   : > { %v546_v22 = vrot.slane %v541_v20, %v1282_v5  ;;  %v513_v24 = vrot.slane %v504_v23, %v1284_v6  ;;  %v509_v25 = vrot.slane %v504_v23, %v1282_v5  ;;  %v590_v27 = vrot.slane %v581_v26, %v1284_v6 }
  0x55   : > { %v586_v28 = vrot.slane %v581_v26, %v1282_v5  ;;  %vm395_vm3 = vcmask 121856   ;;  %vm336_vm4 = vcmask 916480   ;;  %v450_v62 = vrot.slane %v445_v59, %v1282_v5 }
  0x56   : > { %v454_v63 = vrot.slane %v445_v59, %v1284_v6  ;;  %vm417_vm5 = vcmask 1039360   ;;  %vm437_vm6 = vcmask 7168   ;;  %vm356_vm7 = vcmask 130048  }
  0x57   : > { %415 = vrot.lane.b32.xlu1 %v412_v9, %s1118_s11  ;;  %334 = vrot.lane.b32.xlu0 %v331_v10, %s1119_s13  ;;  %vm314_vm8 = vcmask 138240   ;;  %vm638_vm9 = vcmask 1041408   ;;  %vm634_vm10 = vcmask 293888  }
  0x58   : > { %v455_v2 = vcombine.low %v450_v62, %v454_v63 }
  0x5a   : > { %v457_v5 = vmul.f32 %v455_v2, %v1321_v31 }
  0x5b   : > { %295 = vrot.lane.b32.xlu1 %v292_v12, %s1120_s17  ;;  %293 = vrot.lane.b32.xlu0 %v288_v13, %s1120_s17 }
  0x5c   : > { %461 = vst [vmem:[#allocation3 + $0x20] sm:$0xf] %v457_v5 }
  0x5f   : > { %376 = vrot.lane.b32.xlu1 %v373_v15, %s1121_s26  ;;  %374 = vrot.lane.b32.xlu0 %v369_v16, %s1121_s26  ;;  %v459_v15 = vcombine.high %v457_v5, %v457_v5 }
  0x61   : > { %462 = vst [vmem:[#allocation3 + $0x28] sm:$0xf] %v459_v15 }
  0x63   : > { %476 = vrot.lane.b32.xlu1 %v473_v18, %s1122_s30  ;;  %474 = vrot.lane.b32.xlu0 %v469_v19, %s1122_s30 }
  0x67   : > { %553 = vrot.lane.b32.xlu1 %v550_v21, %s1123_s16  ;;  %551 = vrot.lane.b32.xlu0 %v546_v22, %s1123_s16 }
  0x6b   : > { %516 = vrot.lane.b32.xlu1 %v513_v24, %s1124_s6  ;;  %514 = vrot.lane.b32.xlu0 %v509_v25, %s1124_s6 }
  0x6f   : > { %593 = vrot.lane.b32.xlu1 %v590_v27, %s1125_s14  ;;  %591 = vrot.lane.b32.xlu0 %v586_v28, %s1125_s14 }
  0xc5   : > { %v1316_v29 = vpop.permute.xlu1 %413  ;;  %v1318_v30 = vpop.permute.xlu0 %332 }
  0xc6   : > { %v341_v13 = vmul.f32 %v1318_v30, %v1325_v34  ;;  %v422_v19 = vmul.f32 %v1316_v29, %v1325_v34 }
  0xc8   : > { %v347_v20 = vrot.slane %v341_v13, 4  ;;  %v428_v24 = vrot.slane %v422_v19, 4 }
  0xc9   : > { %v416_v32 = vpop.permute.xlu1 %415  ;;  %v335_v33 = vpop.permute.xlu0 %334 }
  0xca   : > { %v337_v0 = vsel %vm336_vm4, %v1318_v30, %v335_v33  ;;  %v343_v3 = vmul.f32 %v335_v33, %v1325_v34  ;;  %v418_v6 = vsel %vm417_vm5, %v1316_v29, %v416_v32  ;;  %v424_v8 = vmul.f32 %v416_v32, %v1325_v34 }
  0xcb   : > { %v342_v4 = vmul.f32 %v337_v0, %v1321_v31  ;;  %v423_v10 = vmul.f32 %v418_v6, %v1321_v31 }
  0xcc   : > { %v349_v9 = vrot.slane %v343_v3, 4  ;;  %v430_v14 = vrot.slane %v424_v8, 4 }
  0xcd   : > { %v296_v35 = vpop.permute.xlu1 %295  ;;  %v294_v36 = vpop.permute.xlu0 %293  ;;  %v348_v11 = vrot.slane %v342_v4, 4  ;;  %v429_v16 = vrot.slane %v423_v10, 4 }
  0xce   : > { %v304_v37 = vmul.f32 %v296_v35, %v1325_v34  ;;  %v302_v38 = vmul.f32 %v294_v36, %v1325_v34  ;;  %v298_v43 = vsel %vm297_vm1, %v294_v36, %v296_v35  ;;  %v1126_v35 = vmov 0  }
  0xcf   : > { %v303_v46 = vmul.f32 %v298_v43, %v1321_v31  ;;  %677 = vmatprep.mubr.bf16.mxu0 %v1126_v35 }
  0xd0   : > { %312 = vrot.lane.b32.xlu1 %v304_v37, %s1125_s14  ;;  %308 = vrot.lane.b32.xlu0 %v302_v38, %s1125_s14 }
  0xd1   : > { %v377_v39 = vpop.permute.xlu1 %376  ;;  %v375_v40 = vpop.permute.xlu0 %374 }
  0xd2   : > { %v385_v41 = vmul.f32 %v377_v39, %v1325_v34  ;;  %v383_v42 = vmul.f32 %v375_v40, %v1325_v34  ;;  %v379_v47 = vsel %vm378_vm2, %v375_v40, %v377_v39 }
  0xd3   : > { %v384_v50 = vmul.f32 %v379_v47, %v1321_v31 }
  0xd4   : > { %393 = vrot.lane.b32.xlu1 %v385_v41, %s1124_s6  ;;  %389 = vrot.lane.b32.xlu0 %v383_v42, %s1124_s6 }
  0xd5   : > { %v1334_v44 = vpop.permute.xlu1 %476  ;;  %v475_v45 = vpop.permute.xlu0 %474 }
  0xd6   : > { %v482_v55 = vmul.f32 %v475_v45, %v1321_v31  ;;  %v478_v12 = vsel %vm437_vm6, %v475_v45, %v1334_v44  ;;  %v484_v25 = vmul.f32 %v1334_v44, %v1321_v31 }
  0xd7   : > { %v483_v17 = vmul.f32 %v478_v12, %v1325_v34 }
  0xd8   : > { %310 = vrot.lane.b32.xlu0 %v303_v46, %s1125_s14  ;;  %v488_v60 = vrot.slane %v482_v55, 4  ;;  %v490_v28 = vrot.slane %v484_v25, 4 }
  0xd9   : > { %v1338_v48 = vpop.permute.xlu1 %553  ;;  %v552_v49 = vpop.permute.xlu0 %551  ;;  %v489_v21 = vrot.slane %v483_v17, 4 }
  0xda   : > { %v559_v61 = vmul.f32 %v552_v49, %v1321_v31  ;;  %v555_v18 = vsel %vm356_vm7, %v552_v49, %v1338_v48  ;;  %v561_v29 = vmul.f32 %v1338_v48, %v1321_v31 }
  0xdb   : > { %v560_v22 = vmul.f32 %v555_v18, %v1325_v34 }
  0xdc   : > { %391 = vrot.lane.b32.xlu0 %v384_v50, %s1124_s6  ;;  %v565_v7 = vrot.slane %v559_v61, 4  ;;  %v567_v32 = vrot.slane %v561_v29, 4 }
  0xdd   : > { %v517_v51 = vpop.permute.xlu1 %516  ;;  %v515_v52 = vpop.permute.xlu0 %514  ;;  %v566_v26 = vrot.slane %v560_v22, 4 }
  0xde   : > { %v524_v53 = vmul.f32 %v517_v51, %v1321_v31  ;;  %v518_v54 = vsel %vm395_vm3, %v515_v52, %v517_v51  ;;  %v522_v57 = vmul.f32 %v515_v52, %v1321_v31 }
  0xdf   : > { %v523_v56 = vmul.f32 %v518_v54, %v1325_v34 }
  0xe0   : > { %532 = vrot.lane.b32.xlu1 %v524_v53, %s1121_s26 }
  0xe1   : > { %530 = vrot.lane.b32.xlu0 %v523_v56, %s1121_s26  ;;  %v592_v58 = vpop.permute.xlu0 %591  ;;  %v594_v23 = vpop.permute.xlu1 %593 }
  0xe2   : > { %v599_v1 = vmul.f32 %v592_v58, %v1321_v31  ;;  %v595_v27 = vsel %vm314_vm8, %v592_v58, %v594_v23  ;;  %v601_v33 = vmul.f32 %v594_v23, %v1321_v31 }
  0xe3   : > { %v600_v30 = vmul.f32 %v595_v27, %v1325_v34  ;;  %v633_v27 = vld [vmem:[%s1483_s1] sm:$0xf] }
  0xe4   : > { %528 = vrot.lane.b32.xlu1 %v522_v57, %s1121_s26 }
  0xe5   : > { %491 = vrot.lane.b32.xlu0 %v488_v60, %s1118_s11 }
  0xe8   : > { %605 = vrot.lane.b32.xlu1 %v599_v1, %s1120_s17 }
  0xe9   : > { %568 = vrot.lane.b32.xlu0 %v565_v7, %s1119_s13 }
  0xec   : > { %354 = vrot.lane.b32.xlu1 %v349_v9, %s1123_s16 }
  0xed   : > { %352 = vrot.lane.b32.xlu0 %v348_v11, %s1123_s16 }
  0xf0   : > { %435 = vrot.lane.b32.xlu1 %v430_v14, %s1122_s30 }
  0xf1   : > { %433 = vrot.lane.b32.xlu0 %v429_v16, %s1122_s30 }
  0xf4   : > { %350 = vrot.lane.b32.xlu1 %v347_v20, %s1123_s16 }
  0xf5   : > { %493 = vrot.lane.b32.xlu0 %v489_v21, %s1118_s11 }
  0xf8   : > { %431 = vrot.lane.b32.xlu1 %v428_v24, %s1122_s30 }
  0xf9   : > { %570 = vrot.lane.b32.xlu0 %v566_v26, %s1119_s13 }
  0xfc   : > { %495 = vrot.lane.b32.xlu1 %v490_v28, %s1118_s11  ;;  %s688_s11 = scalar_lea.vmem [#allocation2], %s884_s12 }
  0xfd   : > { %607 = vrot.lane.b32.xlu0 %v600_v30, %s1120_s17 }
 0x100   : > { %572 = vrot.lane.b32.xlu1 %v567_v32, %s1119_s13 }
 0x104   : > { %609 = vrot.lane.b32.xlu1 %v601_v33, %s1120_s17 }
 0x142   : > { %v309_v36 = vpop.permute.xlu0 %308  ;;  %v313_v38 = vpop.permute.xlu1 %312 }
 0x146   : > { %v390_v37 = vpop.permute.xlu0 %389  ;;  %v394_v41 = vpop.permute.xlu1 %393 }
 0x14a   : > { %v311_v39 = vpop.permute.xlu0 %310 }
 0x14b   : > { %v315_v40 = vsel %vm314_vm8, %v309_v36, %v311_v39  ;;  %v316_v34 = vsel %vm314_vm8, %v311_v39, %v313_v38  ;;  %v691_v38 = vld [vmem:[#allocation4] sm:$0xff] }
 0x14c   : > { %319 = vst [vmem:[#allocation3] sm:$0xf] %v315_v40  ;;  %320 = vst [vmem:[#allocation3 + $0x8] sm:$0xf] %v316_v34  ;;  %v697_v40 = vld [vmem:[#allocation5] sm:$0xff] }
 0x14e   : > { %v392_v42 = vpop.permute.xlu0 %391 }
 0x14f   : > { %v396_v31 = vsel %vm395_vm3, %v390_v37, %v392_v42  ;;  %v397_v43 = vsel %vm395_vm3, %v392_v42, %v394_v41 }
 0x150   : > { %400 = vst [vmem:[#allocation3 + $0x10] sm:$0xf] %v396_v31  ;;  %401 = vst [vmem:[#allocation3 + $0x18] sm:$0xf] %v397_v43 }
 0x152   : > { %v533_v44 = vpop.permute.xlu1 %532 }
 0x153   : > { %v531_v45 = vpop.permute.xlu0 %530 }
 0x154   : > { %v535_v46 = vsel %vm378_vm2, %v531_v45, %v533_v44 }
 0x155   : > { %539 = vst [vmem:[#allocation3 + $0x38] sm:$0xf] %v535_v46 }
 0x156   : > { %v529_v47 = vpop.permute.xlu1 %528 }
 0x157   : > { %v534_v48 = vsel %vm378_vm2, %v529_v47, %v531_v45  ;;  %v492_v49 = vpop.permute.xlu0 %491 }
 0x158   : > { %538 = vst [vmem:[#allocation3 + $0x30] sm:$0xf] %v534_v48 }
 0x15a   : > { %v606_v50 = vpop.permute.xlu1 %605 }
 0x15b   : > { %v569_v51 = vpop.permute.xlu0 %568 }
 0x15e   : > { %v355_v52 = vpop.permute.xlu1 %354 }
 0x15f   : > { %v353_v53 = vpop.permute.xlu0 %352 }
 0x160   : > { %v358_v54 = vsel %vm356_vm7, %v353_v53, %v355_v52 }
 0x161   : > { %362 = vst [vmem:[#allocation3 + $0x8] sm:$0xf0] %v358_v54 }
 0x162   : > { %v436_v55 = vpop.permute.xlu1 %435 }
 0x163   : > { %v434_v56 = vpop.permute.xlu0 %433 }
 0x164   : > { %v439_v57 = vsel %vm437_vm6, %v434_v56, %v436_v55 }
 0x165   : > { %443 = vst [vmem:[#allocation3 + $0x18] sm:$0xf0] %v439_v57 }
 0x166   : > { %v351_v58 = vpop.permute.xlu1 %350 }
 0x167   : > { %v357_v59 = vsel %vm356_vm7, %v351_v58, %v353_v53  ;;  %v494_v60 = vpop.permute.xlu0 %493 }
 0x168   : > { %361 = vst [vmem:[#allocation3] sm:$0xf0] %v357_v59  ;;  %v497_v61 = vsel %vm417_vm5, %v492_v49, %v494_v60  ;;  %v618_v2 = vld [vmem:[#allocation3 + $0x8] sm:$0xff] }
 0x169   : > { %501 = vst [vmem:[#allocation3 + $0x20] sm:$0xf0] %v497_v61 }
 0x16a   : > { %v432_v62 = vpop.permute.xlu1 %431 }
 0x16b   : > { %v438_v63 = vsel %vm437_vm6, %v432_v62, %v434_v56  ;;  %v571_v0 = vpop.permute.xlu0 %570 }
 0x16c   : > { %442 = vst [vmem:[#allocation3 + $0x10] sm:$0xf0] %v438_v63  ;;  %v574_v1 = vsel %vm336_vm4, %v569_v51, %v571_v0  ;;  %v620_v3 = vld [vmem:[#allocation3 + $0x18] sm:$0xff] }
 0x16d   : > { %578 = vst [vmem:[#allocation3 + $0x30] sm:$0xf0] %v574_v1  ;;  %v628_v4 = vpack.c.bf16 %v620_v3, %v618_v2 }
 0x16e   : > { %v496_v7 = vpop.permute.xlu1 %495 }
 0x16f   : > { %v498_v5 = vsel %vm417_vm5, %v494_v60, %v496_v7  ;;  %645 = vmatprep.subr.bf16.mxu0 %v628_v4  ;;  %v608_v6 = vpop.permute.xlu0 %607  ;;  %v617_v11 = vld [vmem:[#allocation3] sm:$0xff] }
 0x170   : > { %502 = vst [vmem:[#allocation3 + $0x28] sm:$0xf0] %v498_v5  ;;  %v611_v8 = vsel %vm297_vm1, %v606_v50, %v608_v6  ;;  %v621_v21 = vld [vmem:[#allocation3 + $0x20] sm:$0xff] }
 0x171   : > { %615 = vst [vmem:[#allocation3 + $0x40] sm:$0xf] %v611_v8 }
 0x172   : > { %v573_v9 = vpop.permute.xlu1 %572 }
 0x173   : > { %v575_v10 = vsel %vm336_vm4, %v571_v0, %v573_v9  ;;  %v619_v12 = vld [vmem:[#allocation3 + $0x10] sm:$0xff] }
 0x174   : > { %579 = vst [vmem:[#allocation3 + $0x38] sm:$0xf0] %v575_v10  ;;  %v627_v13 = vpack.c.bf16 %v619_v12, %v617_v11  ;;  %v623_v16 = vld [vmem:[#allocation3 + $0x30] sm:$0xff] }
 0x175   : > { %v629_v22 = vpack.c.bf16 %v623_v16, %v621_v21 }
 0x176   : > { %v610_v14 = vpop.permute.xlu1 %609  ;;  %646 = vmatpush1.bf16.msra.mxu0 %v627_v13 }
 0x177   : > { %v612_v15 = vsel %vm297_vm1, %v608_v6, %v610_v14  ;;  %v622_v17 = vld [vmem:[#allocation3 + $0x28] sm:$0xff] }
 0x178   : > { %616 = vst [vmem:[#allocation3 + $0x48] sm:$0xf] %v612_v15  ;;  %v625_v19 = vld [vmem:[#allocation3 + $0x40] sm:$0xf] }
 0x179   : > { %v631_v23 = vpack.c.bf16 %v625_v19, %v625_v19 }
 0x17b   : > { %v624_v18 = vld [vmem:[#allocation3 + $0x38] sm:$0xff]  ;;  %v640_v26 = vsel %vm638_vm9, %v631_v23, 0 }
 0x17c   : > { %v630_v20 = vpack.c.bf16 %v624_v18, %v622_v17 }
 0x17e   : > { %647 = vmatprep.subr.bf16.mxu0 %v630_v20 }
 0x17f   : > { %648 = vmatpush1.bf16.msra.mxu0 %v629_v22  ;;  %v626_v24 = vld [vmem:[#allocation3 + $0x48] sm:$0xf] }
 0x180   : > { %v632_v25 = vpack.c.bf16 %v626_v24, %v626_v24 }
 0x182   : > { %870 = vmatprep.subr.msk.bf16.mxu0 %vm638_vm9, %v632_v25 }
 0x183   : > { %650 = vmatpush1.bf16.msra.mxu0 %v640_v26 }
 0x186   : > { %871 = vmatmul.mubr.msk.bf16.vlgmr.msra.gmra.mrb[0].mxu0 %vm634_vm10, %v633_v27 }
 0x259   : > { %v679_v28 = vpop.f32.mrb[0].mxu0 }
 0x25a   : > { %689 = vst [vmem:[%s688_s11] sm:$0xff] %v679_v28  ;;  %v681_v29 = vpop.f32.mrb[1].mxu0  ;;  %v698_v30 = vmul.f32 %v679_v28, %v679_v28 }
 0x25b   : > { %690 = vst [vmem:[%s688_s11 + $0x8] sm:$0xff] %v681_v29  ;;  %v683_v32 = vpop.f32.mrb[2].mxu0  ;;  %v692_v33 = vadd.f32 %v681_v29, %v679_v28  ;;  %v699_v35 = vmul.f32 %v681_v29, %v681_v29 }
 0x25c   : > { %v684_v36 = vpop.f32.mrb[3].mxu0 }
 0x25d   : > { %693 = vadd.xlane.f32.xlu0 %v692_v33  ;;  %v700_v37 = vadd.f32 %v699_v35, %v698_v30 }
 0x25f   : > { %701 = vadd.xlane.f32.xlu1 %v700_v37 }
 0x2ea   : > { %v694_v39 = vpop.xlane.xlu0 %693 }
 0x2eb   : > { %v695_v34 = vadd.f32 %v694_v39, %v691_v38 }
 0x2ec   : > { %v702_v41 = vpop.xlane.xlu1 %701 }
 0x2ed   : > { %696 = vst.msk [vmem:[#allocation4] sm:$0xff] %vm437_vm6, %v695_v34  ;;  %v703_v42 = vadd.f32 %v702_v41, %v697_v40 }
 0x2ef   : > { %704 = vst.msk [vmem:[#allocation5] sm:$0xff] %vm437_vm6, %v703_v42 }
 0x2f0 PF: > { %p874_p11 = scmp.ne.s32.totalorder %s1100_s22, 1 }
 0x2f1   : > { %p875_p0 = scmp.ne.s32.totalorder (!%p874_p11), %s1096_s21, 0 }
 0x2f2   : > { %708 = sbr.rel (%p874_p11) target bundleno = 930 (0x3a2), region = 56 }
 0x2f9   : > { %712 = sbr.rel (%p875_p0) target bundleno = 790 (0x316), region = 60  ;;  %v713_v31 = vld [vmem:[#allocation4] sm:$0xff] (!%p875_p0)  ;;  %v716_v43 = vld [vmem:[#allocation5] sm:$0xff] (!%p875_p0)  ;;  %v721_v50 = vld [vmem:[%s1485_s3] sm:$0xff] (!%p875_p0)  ;;  %vm725_vm11 = vcmask (!%p875_p0), 7168  }
 0x2fa   : > { %v715_v44 = vmul.f32 (!%p875_p0), 0.001953125, %v713_v31  ;;  %v717_v45 = vmul.f32 (!%p875_p0), 0.001953125, %v716_v43  ;;  %v727_v53 = vld [vmem:[%s1486_s4] sm:$0xff] (!%p875_p0) }
 0x2fc   : > { %v718_v46 = vmul.f32 (!%p875_p0), %v715_v44, %v715_v44 }
 0x2fe   : > { %v719_v47 = vsub.f32 (!%p875_p0), %v717_v45, %v718_v46 }
 0x300   : > { %v720_v48 = vmax.f32 %v719_v47, 0.0 }
 0x302   : > { %v722_v49 = vadd.f32 1e-05, %v720_v48 }
 0x304   : > { %983 = vrsqrt.f32 %v722_v49 }
 0x30e   : > { %v984_v51 = vpop.eup %983 }
 0x30f   : > { %v724_v52 = vmul.f32 %v984_v51, %v721_v50 }
 0x311   : > { %726 = vst.msk [vmem:[#allocation6] sm:$0xff] %vm725_vm11, %v724_v52  ;;  %v728_v54 = vmul.f32 %v724_v52, %v715_v44 }
 0x313   : > { %v729_v55 = vsub.f32 %v727_v53, %v728_v54 }
 0x315   : > { %730 = vst.msk [vmem:[#allocation7] sm:$0xff] %vm725_vm11, %v729_v55 }
 0x316 PF: > { %v1127_v57 = vmov 0   ;;  %s885_s16 = sshll.u32 %s1096_s21, 4 }
 0x317   : > { %985 = vset.pattern.permute.xlu0 %v1127_v57  ;;  %s733_s6 = scalar_lea.vmem [#allocation2], %s885_s16 }
 0x318   : > { %v736_v56 = vld [vmem:[#allocation6] sm:$0xff]  ;;  %v735_v61 = vld [vmem:[%s733_s6 + $0x8] sm:$0xff] }
 0x319   : > { %739 = vperm.xlu0 %985, %v736_v56   ;;  %v734_v60 = vld [vmem:[%s733_s6] sm:$0xff] }
 0x31c   : > { %v744_v58 = vld [vmem:[#allocation7] sm:$0xff] }
 0x31d   : > { %747 = vperm.xlu0 %985, %v744_v58  }
 0x398   : > { %v740_v59 = vpop.permute.xlu0 %739 }
 0x399   : > { %v742_v62 = vmul.f32 %v740_v59, %v734_v60  ;;  %v743_v63 = vmul.f32 %v740_v59, %v735_v61 }
 0x39c   : > { %v748_v0 = vpop.permute.xlu0 %747 }
 0x39d   : > { %v750_v1 = vadd.f32 %v748_v0, %v742_v62  ;;  %v751_v2 = vadd.f32 %v748_v0, %v743_v63 }
 0x39f   : > { %v752_v3 = vmax.f32 %v750_v1, 0.0  ;;  %v753_v4 = vmax.f32 %v751_v2, 0.0 }
 0x3a1   : > { %754 = vst [vmem:[%s1278_s29] sm:$0xff] %v752_v3  ;;  %755 = vst [vmem:[%s1278_s29 + $0x8] sm:$0xff] %v753_v4 }
 0x3a2 PF: > { %s764_s14 = smul.u32 %s1096_s21, %s1100_s22  ;;  %s772_s10 = sshll.u32 %s1278_s29, 4  ;;  %s1431_s10 = int_to_ptr.vmem [resolvable:$true] %s772_s10 }
 0x3a3   : > { %s757_s17 = scalar_lea.sflag [#allocation10], %s254_s27  ;;  %s1014_s26 = scalar_lea.vmem %s1431_s10, 256 }
 0x3a4   : > { %s886_s9 = sshll.u32 %s764_s14, 8  ;;  %p1015_p2 = scmp.ne.s32.totalorder %s1431_s10, %s1014_s26 }
 0x3a5   : > { %s770_s13 = scalar_lea.hbm %s1487_s5, %s886_s9  ;;  %p1501_p4 = scmp.ne.s32.totalorder %s1493_s7, 0 }
 0x3a6   : > { %s1128_s30 = smov [#allocation11]  }
 0x3a7   : > { %p1016_p5 = pnand %p1015_p2, %p1501_p4  ;;  %s1018_s21 = sshll.u32 %s1128_s30, 4  ;;  %s1019_s21 = int_to_ptr.vmem [resolvable:$false] %s1018_s21 }
 0x3a8   : > { %s1020_s22 = scalar_lea.vmem %s1019_s21, 512  ;;  %p1021_p9 = scmp.lt.s32.totalorder %s1431_s10, %s1019_s21 }
 0x3a9   : > { %p1017_p7 = pneg %p1016_p5  ;;  %p1022_p12 = scmp.lt.s32.totalorder %s1020_s22, %s1014_s26 }
 0x3ab   : > { %p1023_p13 = por %p1022_p12, %p1021_p9 }
 0x3ad   : > { %p1024_p1 = pnand %p1023_p13, %p1017_p7 }
 0x3af   : > { %1027 = shalt.err (!%p1024_p1)
}
 0x3b0   : > { %s1028_s29 = scalar_lea.hbm %s770_s13, 256  ;;  %s1032_s6 = scalar_lea.hbm %s1487_s5, 512 }
 0x3b1   : > { %p1029_p3 = scmp.ne.s32.totalorder %s770_s13, %s1028_s29  ;;  %p1033_p10 = scmp.lt.u32.totalorder %s770_s13, %s1487_s5 }
 0x3b2   : > { %p1034_p11 = scmp.lt.u32.totalorder %s1032_s6, %s1028_s29  ;;  %p1036_p2 = scmp.lt.u32.totalorder %s1028_s29, %s770_s13 }
 0x3b3   : > { %p1030_p6 = pnand %p1029_p3, %p1501_p4 }
 0x3b4   : > { %p1035_p0 = por %p1034_p11, %p1033_p10 }
 0x3b5   : > { %p1031_p8 = pneg %p1030_p6 }
 0x3b6   : > { %p1037_p5 = por %p1036_p2, %p1035_p0 }
 0x3b8   : > { %p1038_p7 = pnand %p1037_p5, %p1031_p8 }
 0x3ba   : > { %1041 = shalt.err (!%p1038_p7)
}
 0x3bb   : > { %891 = dma.vmem_to_hbm [thread:$0]  (%p1501_p4), %s1431_s10, 256, %s770_s13, %s757_s17  }
 0x3bc PF: > { %p903_p9 = scmp.ge.s32.totalorder %s1112_s25, 2  ;;  %s784_s12 = sand.u32 1, %s1084_s18  }
 0x3bd   : > { %p1502_p12 = scmp.ne.s32.totalorder %s1495_s8, 0  ;;  %s785_s11 = scalar_lea.sflag [#allocation10], %s784_s12 }
 0x3bf   : > { %p898_p13 = pnand %p903_p9, %p1502_p12 }
 0x3c1   : > { %1079 = dma.done.wait (!%p898_p13), %s785_s11, 256  }
 0x3c2   : > { %1081 = vsyncadd (!%p898_p13), %s785_s11, 4294967040  ;;  %s19_s25 = sadd.s32 1, %s1112_s25   ;;  %s1503_s7 = sld [smem:[#allocation14_spill]] }
 0x3c3   : > { %p16_p1 = scmp.ge.s32.totalorder %s19_s25, 6   ;;  %s1504_s18 = smov %s1088_s19 }
 0x3c4   : > { %s1505_s19 = smov %s1092_s20  ;;  %s1506_s20 = smov %s1238_s15 }
 0x3c5   : > { %s1507_s21 = smov %s1104_s23  ;;  %s1508_s22 = smov %s1108_s24 }
 0x3c6   : > { %s1509_s23 = smov %s1512_s28  ;;  %18 = sbr.rel (!%p16_p1) target bundleno = 6 (0x6), region = 106 }
 0x3c8   : > { %s1510_s24 = smov %s1503_s7 }
 0x3cd   :  { %790 = vsyncpa [#allocation9], 1 }
 0x3ce   :  { %792 = vsyncpa [#allocation9 + $0x1], 1 }
 0x3cf   :  { %793 = vsyncpa [#allocation10], 1 }
 0x3d0   :  { %795 = vsyncpa [#allocation10 + $0x1], 1 }

</bundles_post_ra>
